<compile_context>
chip_gen: v7x
topology: tpu7x:2x2x1
jax: 0.10.0
libtpu: 0.0.40
codegen_flags: <defaults>
</compile_context>

<pallas_src>
import functools

import jax
import jax.numpy as jnp
from jax import lax
from jax.experimental import pallas as pl
from jax.experimental.pallas import tpu as pltpu


def _residual_kernel(seed_ref, x_ref, w_ref, b_ref, out_ref, normed_ref, *,
                     eps, alpha, beta, dropout_p, training, d_total,
                     col_tile, n_col_tiles, use_hw_prng, approx_recip,
                     highest_precision):
    i = pl.program_id(0)          # row-tile index   (parallel)
    j = pl.program_id(1)          # column-tile index (arbitrary; often extent 1)

    # --- LayerNormalisation: computed once per row tile, reused across j ---
    @pl.when(j == 0)
    def _():
        x = x_ref[...].astype(jnp.float32)
        mean = jnp.mean(x, axis=-1, keepdims=True)
        centered = x - mean
        # torch.std default: unbiased (ddof=1); eps added to std.
        var_unb = jnp.sum(centered * centered, axis=-1, keepdims=True) / (d_total - 1)
        denom = jnp.sqrt(var_unb) + eps
        if approx_recip:
            inv = pl.reciprocal(denom, approx=True)   # EUP slot (free here)
        else:
            inv = 1.0 / denom                          # exact (f32 parity path)
        normed_ref[...] = (alpha * centered * inv + beta).astype(normed_ref.dtype)

    # --- sublayer: Linear(D, D) on the MXU, f32 accumulation ---
    prec = lax.Precision.HIGHEST if highest_precision else None
    y = jnp.dot(normed_ref[...], w_ref[...],
                preferred_element_type=jnp.float32,
                precision=prec) + b_ref[...].astype(jnp.float32)

    rows, cols = y.shape

    # --- dropout (inverted, train mode) ---
    if training and dropout_p > 0.0:
        if use_hw_prng:
            # Hardware PRNG: per-tile seed keeps it deterministic per (seed, i, j).
            pltpu.prng_seed(seed_ref[0] + i * n_col_tiles + j)
            bits = pltpu.prng_random_bits((rows, cols))
            if bits.dtype != jnp.uint32:
                bits = pltpu.bitcast(bits, jnp.uint32)
        else:
            # Portable lowbias32 counter hash (non-TPU / interpret fallback only).
            row_ids = lax.broadcasted_iota(jnp.int32, (rows, cols), 0) + i * rows
            col_ids = lax.broadcasted_iota(jnp.int32, (rows, cols), 1) + j * cols
            z = (row_ids * d_total + col_ids + seed_ref[0]).astype(jnp.uint32)
            z = z ^ (z >> 16)
            z = z * jnp.uint32(0x7FEB352D)
            z = z ^ (z >> 15)
            z = z * jnp.uint32(0x846CA68B)
            z = z ^ (z >> 16)
            bits = z
        threshold = jnp.uint32(min(int(dropout_p * 4294967296.0), 4294967295))
        keep = bits >= threshold                      # single compare + select
        y = jnp.where(keep, y * (1.0 / (1.0 - dropout_p)), 0.0)

    # --- residual add (x columns matching this column tile) ---
    if n_col_tiles == 1:
        xs = x_ref[...].astype(jnp.float32)
    else:
        start = pl.multiple_of(j * col_tile, col_tile)
        xs = x_ref[:, pl.ds(start, col_tile)].astype(jnp.float32)

    out_ref[...] = (xs + y).astype(out_ref.dtype)


def _vmem_capacity_bytes():
    try:
        info = pltpu.get_tpu_info()
        cap = getattr(info, "vmem_capacity_bytes", None)
        if cap:
            return int(cap)
    except Exception:
        pass
    return 64 * 1024 * 1024   # conservative default (v7x per-TensorCore)


def _pick_tile(total, want, quantum):
    """Largest t <= want dividing `total` that is a multiple of `quantum`
    (or the full extent if nothing smaller works)."""
    if total <= want:
        return total
    t = max(quantum, (want // quantum) * quantum)
    while t >= quantum:
        if total % t == 0:
            return t
        t -= quantum
    return total


def _select_tiles(R, D, x_itemsize, mxu_itemsize, vmem_cap):
    budget = int(vmem_cap * 0.70)

    # Column tile: keep W fully resident (fetched exactly once) when its
    # double-buffered tile fits half the budget; otherwise column-tile W.
    col_tile = D
    if 2 * D * D * mxu_itemsize > budget // 2:
        want = max(256, (budget // 2) // max(1, 2 * D * mxu_itemsize))
        col_tile = _pick_tile(D, min(want, D), 128)

    # Row tile: as large as the remaining budget allows (amortizes W re-streaming).
    remaining = budget - 2 * D * col_tile * mxu_itemsize

    def row_bytes(rt):
        return (2 * rt * D * x_itemsize            # x tile (double-buffered)
                + rt * D * mxu_itemsize            # normed(x) VMEM scratch
                + 2 * rt * col_tile * x_itemsize)  # out tile (double-buffered)

    row_want = 256
    for cand in (4096, 2048, 1024, 512, 256):
        if row_bytes(cand) <= remaining:
            row_want = cand
            break
    row_tile = _pick_tile(R, min(row_want, R), 8)

    # Megacore balance: prefer >= 2 row tiles so both TensorCores get work.
    if row_tile == R and R >= 16 and (R // 2) % 8 == 0:
        row_tile = R // 2
    return row_tile, col_tile


def residual_connection(x, w, b, *, alpha=1.0, beta=0.0, eps=1e-6,
                        dropout_p=0.1, training=True, seed=0,
                        row_tile=None, col_tile=None, mxu_dtype=jnp.bfloat16,
                        use_hw_prng=None):
    """x: (B, S, D); w: (D, D); b: (D,).  Returns (B, S, D)."""
    B, S, D = x.shape
    R = B * S
    x_itemsize = x.dtype.itemsize
    mxu_itemsize = jnp.dtype(mxu_dtype).itemsize
    vmem_cap = _vmem_capacity_bytes()

    auto_row, auto_col = _select_tiles(R, D, x_itemsize, mxu_itemsize, vmem_cap)
    row_tile = auto_row if row_tile is None else min(row_tile, R)
    col_tile = auto_col if col_tile is None else min(col_tile, D)
    # TODO(synk): arbitrary (B, S, D) would need padding/masking; we require
    # divisibility (production D should also be a multiple of 128 for lane-dense
    # stores — the tiny demo D=32 inevitably produces masked partial stores).
    assert R % row_tile == 0, "B*S must be divisible by row_tile"
    assert D % col_tile == 0, "D must be divisible by col_tile"
    n_row_tiles = R // row_tile
    n_col_tiles = D // col_tile

    if use_hw_prng is None:
        use_hw_prng = (jax.default_backend() == "tpu")

    x2 = x.reshape(R, D)
    w2 = w.astype(mxu_dtype)          # ship weights at MXU precision
    b2 = b.reshape(1, D)

    is_f32 = jnp.dtype(mxu_dtype) == jnp.dtype(jnp.float32)
    kernel = functools.partial(
        _residual_kernel, eps=eps, alpha=alpha, beta=beta,
        dropout_p=dropout_p, training=training, d_total=D,
        col_tile=col_tile, n_col_tiles=n_col_tiles,
        use_hw_prng=use_hw_prng,
        approx_recip=not is_f32,
        highest_precision=is_f32)

    # W is fetched once when col_tile == D (constant block index), otherwise it is
    # re-streamed once per row tile.
    w_fetches = 1 if n_col_tiles == 1 else n_row_tiles
    cost = pl.CostEstimate(
        flops=2 * R * D * D + 10 * R * D,
        transcendentals=2 * R,
        bytes_accessed=(R * D * x_itemsize                  # x read
                        + R * D * x_itemsize                # out write
                        + w_fetches * D * D * mxu_itemsize  # W (re-)streamed
                        + D * 4))                           # bias

    vmem_limit = min(int(vmem_cap * 0.85), 100 * 1024 * 1024)

    out = pl.pallas_call(
        kernel,
        out_shape=jax.ShapeDtypeStruct((R, D), x.dtype),
        grid_spec=pltpu.PrefetchScalarGridSpec(
            num_scalar_prefetch=1,                           # seed lives in SMEM
            grid=(n_row_tiles, n_col_tiles),
            in_specs=[
                pl.BlockSpec((row_tile, D), lambda i, j, seed: (i, 0)),    # x rows
                pl.BlockSpec((D, col_tile), lambda i, j, seed: (0, j)),    # W cols
                pl.BlockSpec((1, col_tile), lambda i, j, seed: (0, j)),    # bias
            ],
            out_specs=pl.BlockSpec((row_tile, col_tile), lambda i, j, seed: (i, j)),
            scratch_shapes=[pltpu.VMEM((row_tile, D), mxu_dtype)],         # normed(x)
        ),
        compiler_params=pltpu.CompilerParams(
            dimension_semantics=("parallel", "arbitrary"),
            vmem_limit_bytes=vmem_limit),
        cost_estimate=cost,
    )(jnp.array([seed], jnp.int32), x2, w2, b2)

    return out.reshape(B, S, D)


def _reference_eval(x, w, b, *, alpha=1.0, beta=0.0, eps=1e-6):
    # Pure-JAX reference of the eval-mode forward (dropout = identity).
    mean = jnp.mean(x, axis=-1, keepdims=True)
    std = jnp.std(x, axis=-1, keepdims=True, ddof=1)
    normed = alpha * (x - mean) / (std + eps) + beta
    y = jnp.einsum("bsd,de->bse", normed, w) + b
    return x + y


if __name__ == "__main__":
    key = jax.random.PRNGKey(0)
    kx, kw, kb = jax.random.split(key, 3)

    B, S, D = 2, 8, 32
    x = jax.random.normal(kx, (B, S, D), dtype=jnp.float32)
    # Deterministic synthetic sublayer (Linear D -> D) parameters.
    w = jax.random.normal(kw, (D, D), dtype=jnp.float32) * (1.0 / jnp.sqrt(D))
    b = jax.random.normal(kb, (D,), dtype=jnp.float32) * 0.01

    ref = _reference_eval(x, w, b)

    # Eval mode, f32 MXU inputs (HIGHEST precision): tight check vs pure-JAX ref.
    out_eval_f32 = jax.block_until_ready(
        residual_connection(x, w, b, dropout_p=0.1, training=False,
                            mxu_dtype=jnp.float32))
    assert jnp.allclose(out_eval_f32, ref, atol=1e-4, rtol=1e-4), "eval-mode mismatch (f32)"

    # Eval mode, default bf16 MXU inputs: loose check.
    out_eval_bf16 = jax.block_until_ready(
        residual_connection(x, w, b, dropout_p=0.1, training=False))
    assert jnp.allclose(out_eval_bf16, ref, atol=5e-2, rtol=5e-2), "eval-mode mismatch (bf16)"

    # Train mode (dropout active), deterministic by seed.
    out_train = jax.block_until_ready(
        residual_connection(x, w, b, dropout_p=0.1, training=True, seed=42))
    assert out_train.shape == (B, S, D)
    assert bool(jnp.any(out_train != out_eval_bf16)), "dropout had no effect"

    print("KERNEL_OK")
</pallas_src>

<mosaic_0001>
module attributes {stable_mosaic.version = 11 : i64} {
  func.func @_residual_kernel(%arg0: i32, %arg1: i32, %arg2: memref<1xi32, #tpu.memory_space<smem>>, %arg3: memref<8x32xf32, #tpu.memory_space<vmem>>, %arg4: memref<32x32xf32, #tpu.memory_space<vmem>>, %arg5: memref<1x32xf32, #tpu.memory_space<vmem>>, %arg6: memref<8x32xf32, #tpu.memory_space<vmem>>, %arg7: memref<8x32xf32, #tpu.memory_space<vmem>>) attributes {dimension_semantics = [#tpu.dimension_semantics<parallel>, #tpu.dimension_semantics<arbitrary>], iteration_bounds = array<i64: 2, 1>, scalar_prefetch = 1 : i64, scratch_operands = 1 : i64, tpu.core_type = #tpu.core_type<tc>, window_params = [{transform_indices = @transform_0, window_bounds = array<i64: 8, 32>}, {transform_indices = @transform_1, window_bounds = array<i64: 32, 32>}, {transform_indices = @transform_2, window_bounds = array<i64: 1, 32>}, {transform_indices = @transform_3, window_bounds = array<i64: 8, 32>}]} {
    %c0_i32 = arith.constant 0 : i32
    %0 = arith.cmpi eq, %arg1, %c0_i32 : i32
    %1 = arith.extui %0 : i1 to i32
    %c0_i32_0 = arith.constant 0 : i32
    %2 = arith.cmpi ne, %1, %c0_i32_0 : i32
    scf.if %2 {
      %c0_10 = arith.constant 0 : index
      %c0_11 = arith.constant 0 : index
      %12 = vector.load %arg3[%c0_10, %c0_11] : memref<8x32xf32, #tpu.memory_space<vmem>>, vector<8x32xf32>
      %cst_12 = arith.constant dense<0.000000e+00> : vector<8xf32>
      %13 = vector.multi_reduction <add>, %12, %cst_12 [1] : vector<8x32xf32> to vector<8xf32>
      %14 = vector.shape_cast %13 : vector<8xf32> to vector<8x1xf32>
      %cst_13 = arith.constant 3.200000e+01 : f32
      %15 = vector.broadcast %cst_13 : f32 to vector<8x1xf32>
      %16 = arith.divf %14, %15 : vector<8x1xf32>
      %17 = vector.broadcast %16 : vector<8x1xf32> to vector<8x32xf32>
      %18 = arith.subf %12, %17 : vector<8x32xf32>
      %19 = arith.mulf %18, %18 : vector<8x32xf32>
      %cst_14 = arith.constant dense<0.000000e+00> : vector<8xf32>
      %20 = vector.multi_reduction <add>, %19, %cst_14 [1] : vector<8x32xf32> to vector<8xf32>
      %21 = vector.shape_cast %20 : vector<8xf32> to vector<8x1xf32>
      %cst_15 = arith.constant 3.100000e+01 : f32
      %22 = vector.broadcast %cst_15 : f32 to vector<8x1xf32>
      %23 = arith.divf %21, %22 : vector<8x1xf32>
      %24 = math.sqrt %23 : vector<8x1xf32>
      %cst_16 = arith.constant 9.99999997E-7 : f32
      %25 = vector.broadcast %cst_16 : f32 to vector<8x1xf32>
      %26 = arith.addf %24, %25 : vector<8x1xf32>
      %cst_17 = arith.constant 1.000000e+00 : f32
      %27 = vector.broadcast %cst_17 : f32 to vector<8x1xf32>
      %28 = arith.divf %27, %26 : vector<8x1xf32>
      %cst_18 = arith.constant 1.000000e+00 : f32
      %29 = vector.broadcast %cst_18 : f32 to vector<8x32xf32>
      %30 = arith.mulf %29, %18 : vector<8x32xf32>
      %31 = vector.broadcast %28 : vector<8x1xf32> to vector<8x32xf32>
      %32 = arith.mulf %30, %31 : vector<8x32xf32>
      %cst_19 = arith.constant 0.000000e+00 : f32
      %33 = vector.broadcast %cst_19 : f32 to vector<8x32xf32>
      %34 = arith.addf %32, %33 : vector<8x32xf32>
      %c0_20 = arith.constant 0 : index
      %c0_21 = arith.constant 0 : index
      %35 = vector.load %arg7[%c0_20, %c0_21] : memref<8x32xf32, #tpu.memory_space<vmem>>, vector<8x32xf32>
      tpu.vector_store %arg7[%c0_20, %c0_21], %34 {strides = array<i32>} : memref<8x32xf32, #tpu.memory_space<vmem>>, vector<8x32xf32>,
    } else {
    }
    %c0 = arith.constant 0 : index
    %c0_1 = arith.constant 0 : index
    %3 = vector.load %arg7[%c0, %c0_1] : memref<8x32xf32, #tpu.memory_space<vmem>>, vector<8x32xf32>
    %c0_2 = arith.constant 0 : index
    %c0_3 = arith.constant 0 : index
    %4 = vector.load %arg4[%c0_2, %c0_3] : memref<32x32xf32, #tpu.memory_space<vmem>>, vector<32x32xf32>
    %cst = arith.constant dense<0.000000e+00> : vector<8x32xf32>
    %5 = tpu.matmul %3, %4, %cst {dimension_numbers = #tpu.dot_dimension_numbers<[1], [0], [0], [1], [0, 0, 1, 1], [], []>, precision = #tpu.contract_precision<fp32>} : vector<8x32xf32>, vector<32x32xf32>, vector<8x32xf32> -> vector<8x32xf32>
    %c0_4 = arith.constant 0 : index
    %c0_5 = arith.constant 0 : index
    %6 = vector.load %arg5[%c0_4, %c0_5] : memref<1x32xf32, #tpu.memory_space<vmem>>, vector<1x32xf32>
    %7 = vector.broadcast %6 : vector<1x32xf32> to vector<8x32xf32>
    %8 = arith.addf %5, %7 : vector<8x32xf32>
    %c0_6 = arith.constant 0 : index
    %c0_7 = arith.constant 0 : index
    %9 = vector.load %arg3[%c0_6, %c0_7] : memref<8x32xf32, #tpu.memory_space<vmem>>, vector<8x32xf32>
    %10 = arith.addf %9, %8 : vector<8x32xf32>
    %c0_8 = arith.constant 0 : index
    %c0_9 = arith.constant 0 : index
    %11 = vector.load %arg6[%c0_8, %c0_9] : memref<8x32xf32, #tpu.memory_space<vmem>>, vector<8x32xf32>
    tpu.vector_store %arg6[%c0_8, %c0_9], %10 {strides = array<i32>} : memref<8x32xf32, #tpu.memory_space<vmem>>, vector<8x32xf32>,
    return
  }
  func.func @transform_0(%arg0: i32, %arg1: i32, %arg2: memref<1xi32, #tpu.memory_space<smem>>) -> (i32, i32) {
    %c0_i32 = arith.constant 0 : i32
    %c0_i32_0 = arith.constant 0 : i32
    return %arg0, %c0_i32 : i32, i32
  }
  func.func @transform_1(%arg0: i32, %arg1: i32, %arg2: memref<1xi32, #tpu.memory_space<smem>>) -> (i32, i32) {
    %c0_i32 = arith.constant 0 : i32
    %c0_i32_0 = arith.constant 0 : i32
    return %c0_i32, %arg1 : i32, i32
  }
  func.func @transform_2(%arg0: i32, %arg1: i32, %arg2: memref<1xi32, #tpu.memory_space<smem>>) -> (i32, i32) {
    %c0_i32 = arith.constant 0 : i32
    %c0_i32_0 = arith.constant 0 : i32
    return %c0_i32, %arg1 : i32, i32
  }
  func.func @transform_3(%arg0: i32, %arg1: i32, %arg2: memref<1xi32, #tpu.memory_space<smem>>) -> (i32, i32) {
    %c0_i32 = arith.constant 0 : i32
    return %arg0, %arg1 : i32, i32
  }
}

</mosaic_0001>

<bundles_post_ra>
// kernel: tpu_custom_call.1
= control target key start
LH: loop header
LB: loop body
LE: loop exit
PB: predicated region body
PF: predicated region fallthrough
CT: control target
= control target key end

     0   :  { %10 = vsyncpa [#allocation6], 0  ;;  %s1575_s0 = inlined_call_operand.<no memory space> [shape: s32[1], index: 0, kind: input, shape index: {}]   ;;  %s1576_s1 = inlined_call_operand.hbm [shape: f32[16,32], index: 1, kind: input, shape index: {}]   ;;  %s1577_s2 = inlined_call_operand.hbm [shape: f32[32,32], index: 2, kind: input, shape index: {}]   ;;  %s1578_s3 = inlined_call_operand.vmem [shape: f32[1,32], index: 3, kind: input, shape index: {}]   ;;  %s1579_s4 = inlined_call_operand.hbm [shape: f32[16,32], index: 4, kind: output, shape index: {}]  }
   0x1   :  { %12 = vsyncpa [#allocation6 + $0x1], 0 }
   0x2   :  { %13 = vsyncpa [#allocation9], 0 }
   0x3   :  { %14 = vsyncpa [#allocation7], 0 }
   0x4   :  { %16 = vsyncpa [#allocation7 + $0x1], 0  ;;  %s1301_s15 = smov 0   ;;  %s1303_s0 = smov 0  }
   0x5   :  { %s1305_s16 = smov 0   ;;  %s1307_s17 = smov 0  }
   0x6   :  { %s1309_s18 = smov 0   ;;  %s1311_s19 = smov 0  }
   0x7 LB: > { %s891_s20 = sadd.s32 4294967295, %s1266_s19   ;;  %s892_s21 = sadd.s32 4294967294, %s1266_s19   ;;  %s1266_s19 = sphi %s1311_s19, %s22_s19   ;;  %s1262_s18 = sphi %s1309_s18, %s1603_s18   ;;  %s1258_s17 = sphi %s1307_s17, %s1602_s17   ;;  %s1254_s16 = sphi %s1305_s16, %s1601_s16   ;;  %s1250_s0 = sphi %s1303_s0, %s1600_s0   ;;  %s1246_s15 = sphi %s1301_s15, %s1599_s15  }
   0x8   : > { %p54_p0 = scmp.ne.s32.totalorder %s1250_s0, %s1246_s15  ;;  %p1335_p1 = scmp.eq.s32.totalorder %s891_s20, 0 }
   0x9   : > { %p1339_p2 = scmp.eq.s32.totalorder %s891_s20, 1  ;;  %p138_p3 = scmp.eq.s32.totalorder %s892_s21, 1 }
   0xa   : > { %s1584_s22 = scalar_select %p1335_p1, 1, 0 }
   0xb   : > { %s1585_s23 = scalar_select %p1339_p2, 1, 0 }
   0xc   : > { %p1345_p4 = por %p1335_p1, %p54_p0  ;;  %p893_p5 = scmp.ge.s32.totalorder %s1266_s19, 1 }
   0xd   : > { %p1350_p6 = por %p138_p3, %p54_p0  ;;  %p145_p7 = scmp.lt.s32.totalorder %s1266_s19, 3 }
   0xe   : > { %s1586_s24 = scalar_select %p1345_p4, 1, 0 }
   0xf   : > { %s1587_s25 = scalar_select %p1350_p6, 1, 0 }
  0x10   : > { %p1355_p8 = pnand %p893_p5, %p145_p7  ;;  %s1268_s27 = smov [#allocation8]  }
  0x11   : > { %s159_s28 = sshll.u32 %s1268_s27, 4  ;;  %s34_s30 = sadd.s32 1, %s1262_s18  ;;  %s160_s28 = int_to_ptr.vmem [resolvable:$true] %s159_s28 }
  0x12   : > { %s1588_s26 = scalar_select %p1355_p8, 1, 0 }
  0x13   : > { %p1048_p9 = pneg %p1355_p8  ;;  %s1122_s7 = scalar_lea.hbm %s1577_s2, 512 }
  0x14   : > { %p1123_p12 = scmp.ne.s32.totalorder %s1577_s2, %s1122_s7  ;;  %p1129_p5 = scmp.lt.u32.totalorder %s1122_s7, %s1577_s2 }
  0x15   : > { %p1364_p11 = pnand %p1048_p9, %p1335_p1 }
  0x17   : > { %p1124_p13 = pneg %p1364_p11 }
  0x19   : > { %p1125_p0 = pnand %p1124_p13, %p1123_p12 }
  0x1b   : > { %p1126_p3 = pneg %p1125_p0 }
  0x1d   : > { %p1131_p7 = pnand %p1129_p5, %p1126_p3 }
  0x1f   : > { %1134 = shalt.err (!%p1131_p7)
}
  0x20   : > { %s1135_s12 = scalar_lea.vmem %s160_s28, 512  ;;  %p1143_p1 = scmp.lt.s32.totalorder %s160_s28, %s160_s28 }
  0x21   : > { %p1136_p9 = scmp.ne.s32.totalorder %s160_s28, %s1135_s12  ;;  %p1144_p4 = scmp.lt.s32.totalorder %s1135_s12, %s1135_s12 }
  0x23   : > { %p1138_p10 = pnand %p1136_p9, %p1124_p13  ;;  %p1145_p8 = por %p1144_p4, %p1143_p1 }
  0x25   : > { %p1139_p6 = pneg %p1138_p10 }
  0x27   : > { %p1146_p2 = pnand %p1145_p8, %p1139_p6 }
  0x29   : > { %1149 = shalt.err (!%p1146_p2)
}
  0x2a   : > { %s1269_s13 = smov 128   ;;  %s1270_s14 = smov 8  }
  0x2b   : > { %1051 = dma.hbm_to_vmem [thread:$0]  (!%p1364_p11), %s1577_s2, 512, %s160_s28, [#allocation9], %s1269_s13, %s1269_s13, %s1270_s14  }
  0x2c   : > { %p36_p1 = scmp.ge.s32.totalorder %s34_s30, 2  ;;  %s41_s27 = sadd.s32 1, %s1254_s16 }
  0x2d   : > { %p48_p2 = scmp.ne.s32.totalorder %s1254_s16, %s1250_s0  ;;  %p49_p4 = scmp.eq.s32.totalorder %s1266_s19, 0 }
  0x2e   : > { %s1605_s30 = smov (%p36_p1, %s34_s30), 0  ;;  %p1591_p8 = scmp.ne.s32.totalorder %s1585_s23, 0 }
  0x2f   : > { %p1391_p6 = por %p49_p4, %p48_p2  ;;  %s38_s29 = ssub.s32 %s1262_s18, %s1605_s30 }
  0x30   : > { %p1397_p10 = por %p1591_p8, %p48_p2  ;;  %p1061_p12 = scmp.lt.s32.totalorder %s1266_s19, 2 }
  0x31   : > { %p39_p11 = scmp.eq.s32.totalorder %s38_s29, 0  ;;  %s179_s28 = sand.u32 1, %s1254_s16  }
  0x32   : > { %s897_s7 = sshll.u32 %s179_s28, 3  ;;  %s898_s9 = sshll.u32 %s1262_s18, 7 }
  0x33   : > { %s1406_s8 = scalar_select %p39_p11, %s1254_s16, %s41_s27  }
  0x34   : > { %s1412_s12 = scalar_lea.hbm %s1576_s1, %s898_s9  ;;  %s183_s23 = scalar_lea.vmem [#allocation5], %s897_s7 }
  0x35   : > { %s190_s13 = sshll.u32 %s183_s23, 4  ;;  %p1418_p13 = pnand %p1061_p12, %p1391_p6  ;;  %s1414_s13 = int_to_ptr.vmem [resolvable:$true] %s190_s13 }
  0x36   : > { %s180_s20 = scalar_lea.sflag [#allocation6], %s179_s28  ;;  %s1150_s21 = scalar_lea.hbm %s1412_s12, 128 }
  0x37   : > { %p1151_p0 = scmp.ne.s32.totalorder %s1412_s12, %s1150_s21  ;;  %p1152_p3 = pneg %p1418_p13 }
  0x38   : > { %s1155_s7 = scalar_lea.hbm %s1576_s1, 256  ;;  %p1156_p9 = scmp.lt.u32.totalorder %s1412_s12, %s1576_s1 }
  0x39   : > { %p1153_p5 = pnand %p1152_p3, %p1151_p0  ;;  %p1157_p1 = scmp.lt.u32.totalorder %s1155_s7, %s1150_s21 }
  0x3a   : > { %p1159_p4 = scmp.lt.u32.totalorder %s1150_s21, %s1412_s12 }
  0x3b   : > { %p1154_p7 = pneg %p1153_p5  ;;  %p1158_p2 = por %p1157_p1, %p1156_p9 }
  0x3d   : > { %p1160_p6 = por %p1159_p4, %p1158_p2 }
  0x3f   : > { %p1161_p8 = pnand %p1160_p6, %p1154_p7 }
  0x41   : > { %1164 = shalt.err (!%p1161_p8)
}
  0x42   : > { %s1165_s28 = scalar_lea.vmem %s1414_s13, 128  ;;  %s1271_s10 = smov [#allocation5]  }
  0x43   : > { %p1166_p12 = scmp.ne.s32.totalorder %s1414_s13, %s1165_s28  ;;  %s1170_s11 = sshll.u32 %s1271_s10, 4  ;;  %s1171_s11 = int_to_ptr.vmem [resolvable:$false] %s1170_s11 }
  0x44   : > { %s1172_s23 = scalar_lea.vmem %s1171_s11, 256  ;;  %p1173_p5 = scmp.lt.s32.totalorder %s1414_s13, %s1171_s11 }
  0x45   : > { %p1168_p11 = pnand %p1166_p12, %p1152_p3  ;;  %p1174_p9 = scmp.lt.s32.totalorder %s1172_s23, %s1165_s28 }
  0x47   : > { %p1169_p0 = pneg %p1168_p11  ;;  %p1175_p1 = por %p1174_p9, %p1173_p5 }
  0x49   : > { %p1176_p2 = pnand %p1175_p1, %p1169_p0 }
  0x4b   : > { %1179 = shalt.err (!%p1176_p2)
}
  0x4c   : > { %1055 = dma.hbm_to_vmem [thread:$0]  (!%p1418_p13), %s1412_s12, 128, %s1414_s13, %s180_s20  }
  0x4d   : > { %p1594_p7 = scmp.ne.s32.totalorder %s1588_s26, 0 }
  0x4e   : > { %s1450_s21 = sand.u32 (!%p1594_p7), 1, %s1250_s0   ;;  %p1595_p3 = scmp.ne.s32.totalorder (!%p1594_p7), %s1586_s24, 0 }
  0x4f   : > { %199 = sbr.rel (%p1594_p7) target bundleno = 682 (0x2aa), region = 32  ;;  %s900_s27 = sshll.u32 (!%p1594_p7), %s1450_s21, 3 }
  0x50   : > { %s202_s29 = scalar_lea.sflag (!%p1594_p7), [#allocation6], %s1450_s21  ;;  %s205_s7 = scalar_lea.vmem (!%p1594_p7), [#allocation5], %s900_s27 }
  0x56   : > { %1233 = dma.done.wait (%p1595_p3), %s202_s29, 128  }
  0x57   : > { %1235 = vsyncadd (%p1595_p3), %s202_s29, 4294967168  ;;  %p1596_p13 = scmp.ne.s32.totalorder %s1584_s22, 0 }
  0x59   : > { %1237 = dma.done.wait (%p1596_p13), [#allocation9], 512  }
  0x5a   : > { %1239 = vsyncadd (%p1596_p13), [#allocation9], 4294966784  ;;  %vm243_vm0 = vcmask 261120   ;;  %v1464_v0 = vld [vmem:[%s205_s7] sm:$0xff]  ;;  %v270_v7 = vld [vmem:[#allocation8] sm:$0xff]  ;;  %v1272_v28 = vmov 0.0|0.0  }
  0x5b   : > { %v244_v1 = vsel %vm243_vm0, %v1464_v0, 0.0  ;;  %v271_v8 = vld [vmem:[#allocation8 + $0x8] sm:$0xff]  ;;  %v286_v9 = vand.u32 4294901760, %v270_v7  ;;  %v272_v13 = vld [vmem:[#allocation8 + $0x10] sm:$0xff]  ;;  %v273_v14 = vld [vmem:[#allocation8 + $0x18] sm:$0xff]  ;;  %1010 = vmatprep.subr.bf16.mxu1 %v1272_v28  ;;  %1004 = vmatprep.subr.bf16.mxu0 %v1272_v28  ;;  %vm1273_vm1 = vmmov 0  }
  0x5c   : > { %245 = vadd.xlane.f32.xlu0 %v244_v1  ;;  %v289_v10 = vand.u32 4294901760, %v271_v8  ;;  %v292_v17 = vand.u32 4294901760, %v272_v13  ;;  %v295_v18 = vand.u32 4294901760, %v273_v14  ;;  %v1274_v32 = vmov 0.0   ;;  %v903_v60 = vld [vmem:[%s1578_s3] ss:$0 sm:$0xff] }
  0x5d   : > { %v1474_v11 = vsub.f32 %v270_v7, %v286_v9  ;;  %957 = vmatprep.mubr.msk.f32.mxu1 %vm1273_vm1, %v1274_v32  ;;  %946 = vmatprep.mubr.msk.f32.mxu0 %vm1273_vm1, %v1274_v32  ;;  %s905_s26 = sshll.u32 %s1258_s17, 7  ;;  %s234_s12 = scalar_lea.vmem [#allocation10], %s900_s27 }
  0x5e   : > { %v1476_v12 = vsub.f32 %v271_v8, %v289_v10  ;;  %v1482_v21 = vsub.f32 %v272_v13, %v292_v17  ;;  %v1484_v22 = vsub.f32 %v273_v14, %v295_v18  ;;  %v1005_v27 = vpack.c.bf16 %v289_v10, %v286_v9  ;;  %s788_s13 = sshll.u32 %s234_s12, 4  ;;  %s1525_s5 = scalar_lea.hbm %s1579_s4, %s905_s26  ;;  %s1527_s13 = int_to_ptr.vmem [resolvable:$true] %s788_s13 }
  0x5f   : > { %v367_v15 = vand.u32 4294901760, %v1474_v11  ;;  %v1008_v36 = vpack.c.bf16 %v295_v18, %v292_v17  ;;  %s774_s9 = scalar_lea.sflag [#allocation7], %s1450_s21  ;;  %s1180_s17 = scalar_lea.vmem %s1527_s13, 128 }
  0x60   : > { %v374_v16 = vand.u32 4294901760, %v1476_v12  ;;  %v381_v25 = vand.u32 4294901760, %v1482_v21  ;;  %v388_v26 = vand.u32 4294901760, %v1484_v22  ;;  %1006 = vmatpush3.bf16.msra.mxu0 %v1005_v27  ;;  %v1017_v37 = vpack.c.bf16 %v1476_v12, %v1474_v11  ;;  %p1181_p4 = scmp.ne.s32.totalorder %s1527_s13, %s1180_s17  ;;  %s1275_s28 = smov [#allocation10]  }
  0x61   : > { %v368_v19 = vsub.f32 %v1474_v11, %v367_v15  ;;  %1007 = vmatprep.subr.bf16.mxu0 %v1272_v28  ;;  %v1020_v38 = vpack.c.bf16 %v1484_v22, %v1482_v21  ;;  %s1184_s10 = sshll.u32 %s1275_s28, 4  ;;  %s1185_s10 = int_to_ptr.vmem [resolvable:$false] %s1184_s10 }
  0x62   : > { %v375_v20 = vsub.f32 %v1476_v12, %v374_v16  ;;  %v382_v30 = vsub.f32 %v1482_v21, %v381_v25  ;;  %v389_v31 = vsub.f32 %v1484_v22, %v388_v26  ;;  %v1029_v39 = vpack.c.bf16 %v374_v16, %v367_v15  ;;  %p1182_p6 = pnand %p1181_p4, %p1397_p10  ;;  %s1186_s11 = scalar_lea.vmem %s1185_s10, 256 }
  0x63   : > { %v369_v23 = vand.u32 4294901760, %v368_v19  ;;  %v1032_v40 = vpack.c.bf16 %v388_v26, %v381_v25  ;;  %p1187_p12 = scmp.lt.s32.totalorder %s1527_s13, %s1185_s10  ;;  %p1188_p11 = scmp.lt.s32.totalorder %s1186_s11, %s1180_s17 }
  0x64   : > { %v376_v24 = vand.u32 4294901760, %v375_v20  ;;  %v383_v33 = vand.u32 4294901760, %v382_v30  ;;  %v390_v34 = vand.u32 4294901760, %v389_v31  ;;  %1009 = vmatpush3.bf16.msra.mxu0 %v1008_v36  ;;  %p1183_p8 = pneg %p1182_p6 }
  0x65   : > { %1016 = vmatprep.subr.bf16.mxu0 %v1272_v28  ;;  %p1189_p0 = por %p1188_p11, %p1187_p12 }
  0x66   : > { %v1011_v29 = vpack.c.bf16 %v376_v24, %v369_v23  ;;  %v1014_v35 = vpack.c.bf16 %v390_v34, %v383_v33 }
  0x67   : > { %p1190_p5 = pnand %p1189_p0, %p1183_p8 }
  0x68   : > { %1012 = vmatpush3.bf16.msra.mxu1 %v1011_v29 }
  0x69   : > { %1013 = vmatprep.subr.bf16.mxu1 %v1272_v28 }
  0x6c   : > { %1015 = vmatpush3.bf16.msra.mxu1 %v1014_v35 }
  0x6d   : > { %1022 = vmatprep.subr.bf16.mxu1 %v1272_v28 }
  0xe9   : > { %v246_v2 = vpop.xlane.xlu0 %245 }
  0xea   : > { %v248_v3 = vmul.f32 0.03125, %v246_v2 }
  0xec   : > { %v1469_v4 = vsub.f32 %v1464_v0, %v248_v3 }
  0xee   : > { %v250_v5 = vmul.f32 %v1469_v4, %v1469_v4 }
  0xf0   : > { %v251_v6 = vsel %vm243_vm0, %v250_v5, 0.0 }
  0xf1   : > { %252 = vadd.xlane.f32.xlu0 %v251_v6 }
 0x17e   : > { %v253_v41 = vpop.xlane.xlu0 %252 }
 0x17f   : > { %v255_v42 = vmul.f32 0.032258064, %v253_v41 }
 0x181   : > { %1118 = vrsqrt.f32 %v255_v42  ;;  %vm258_vm2 = vcmp.eq.f32.partialorder %v255_v42, inf  ;;  %v261_v45 = vand.u32 2147483648, %v255_v42  ;;  %vm260_vm3 = vcmp.eq.f32.partialorder %v255_v42, 0.0 }
 0x18b   : > { %v1119_v43 = vpop.eup %1118 }
 0x18c   : > { %v257_v44 = vmul.f32 %v1119_v43, %v255_v42 }
 0x18e   : > { %v259_v46 = vsel %vm258_vm2, %v255_v42, %v257_v44 }
 0x18f   : > { %v262_v47 = vsel %vm260_vm3, %v261_v45, %v259_v46 }
 0x190   : > { %v263_v48 = vadd.f32 1e-06, %v262_v47 }
 0x192   : > { %1120 = vrcp.f32 %v263_v48 }
 0x19c   : > { %v1121_v49 = vpop.eup %1120 }
 0x19d   : > { %v266_v50 = vmul.f32 %v1121_v49, %v1469_v4 }
 0x19f   : > { %268 = vst.msk [vmem:[#allocation2] sm:$0xff] %vm243_vm0, %v266_v50 }
 0x1a6   : > { %v269_v51 = vld [vmem:[#allocation2] sm:$0xff] }
 0x1a7   : > { %v283_v52 = vsel %vm243_vm0, %v269_v51, 0 }
 0x1a8   : > { %v354_v53 = vand.u32 4294901760, %v283_v52 }
 0x1aa   : > { %v355_v54 = vsub.f32 %v283_v52, %v354_v53  ;;  %958 = vmatmul.mubr.f32.vlgmr.msra.gmra.mrb[0].mxu1 %v354_v53 }
 0x1ab   : > { %1024 = vmatpush3.bf16.msra.mxu1 %v1005_v27  ;;  %979 = vmatprep.mubr.msk.f32.mxu1 %vm1273_vm1, %v1274_v32 }
 0x1ac   : > { %1025 = vmatprep.subr.bf16.mxu1 %v1272_v28  ;;  %v356_v55 = vand.u32 4294901760, %v355_v54 }
 0x1ae   : > { %v357_v56 = vsub.f32 %v355_v54, %v356_v55 }
 0x1af   : > { %1027 = vmatpush3.bf16.msra.mxu1 %v1008_v36 }
 0x1b0   : > { %1034 = vmatprep.subr.bf16.mxu1 %v1272_v28  ;;  %v358_v57 = vand.u32 4294901760, %v357_v56 }
 0x1b2   : > { %980 = vmatmul.mubr.f32.vlgmr.msra.gmra.mrb[2].mxu1 %v356_v55  ;;  %947 = vmatmul.mubr.f32.vlgmr.msra.gmra.mrb[0].mxu0 %v358_v57 }
 0x1b3   : > { %1018 = vmatpush3.bf16.msra.mxu0 %v1017_v37  ;;  %1036 = vmatpush3.bf16.msra.mxu1 %v1005_v27 }
 0x1b4   : > { %1019 = vmatprep.subr.bf16.mxu0 %v1272_v28  ;;  %1037 = vmatprep.subr.bf16.mxu1 %v1272_v28 }
 0x1b5   : > { %968 = vmatprep.mubr.msk.f32.mxu0 %vm1273_vm1, %v1274_v32  ;;  %1001 = vmatprep.mubr.msk.f32.mxu1 %vm1273_vm1, %v1274_v32 }
 0x1b7   : > { %1021 = vmatpush3.bf16.msra.mxu0 %v1020_v38  ;;  %1039 = vmatpush3.bf16.msra.mxu1 %v1008_v36 }
 0x1b8   : > { %1028 = vmatprep.subr.bf16.mxu0 %v1272_v28 }
 0x1ba   : > { %969 = vmatmul.mubr.f32.vlgmr.msra.gmra.mrb[2].mxu0 %v355_v54  ;;  %1002 = vmatmul.mubr.f32.vlgmr.msra.gmra.mrb[4].mxu1 %v354_v53 }
 0x1bb   : > { %1030 = vmatpush3.bf16.msra.mxu0 %v1029_v39  ;;  %990 = vmatprep.mubr.msk.f32.mxu0 %vm1273_vm1, %v1274_v32 }
 0x1bc   : > { %1031 = vmatprep.subr.bf16.mxu0 %v1272_v28 }
 0x1bf   : > { %1033 = vmatpush3.bf16.msra.mxu0 %v1032_v40 }
 0x1c2   : > { %991 = vmatmul.mubr.f32.vlgmr.msra.gmra.mrb[4].mxu0 %v354_v53 }
 0x27d   : > { %v451_v58 = vpop.f32.mrb[0].mxu1 }
 0x27e   : > { %v959_v59 = vpop.f32.mrb[1].mxu1 }
 0x285   : > { %v608_v61 = vpop.f32.mrb[2].mxu1  ;;  %v360_v62 = vpop.f32.mrb[0].mxu0 }
 0x286   : > { %v361_v63 = vadd.f32 %v903_v60, %v360_v62  ;;  %v981_v1 = vpop.f32.mrb[3].mxu1  ;;  %v948_v2 = vpop.f32.mrb[1].mxu0 }
 0x288   : > { %v452_v3 = vadd.f32 %v451_v58, %v361_v63 }
 0x28d   : > { %v531_v4 = vpop.f32.mrb[2].mxu0  ;;  %v766_v5 = vpop.f32.mrb[4].mxu1 }
 0x28e   : > { %v532_v6 = vadd.f32 %v531_v4, %v452_v3  ;;  %v970_v7 = vpop.f32.mrb[3].mxu0  ;;  %v1003_v8 = vpop.f32.mrb[5].mxu1 }
 0x290   : > { %v609_v9 = vadd.f32 %v608_v61, %v532_v6 }
 0x295   : > { %v691_v10 = vpop.f32.mrb[4].mxu0 }
 0x296   : > { %v692_v11 = vadd.f32 %v691_v10, %v609_v9  ;;  %v992_v12 = vpop.f32.mrb[5].mxu0 }
 0x298   : > { %v767_v13 = vadd.f32 %v766_v5, %v692_v11 }
 0x29a   : > { %v771_v14 = vadd.f32 %v767_v13, %v1464_v0 }
 0x29c   : > { %772 = vst.msk [vmem:[%s234_s12] sm:$0xff] %vm243_vm0, %v771_v14 }
 0x29d   : > { %1193 = shalt.err (!%p1190_p5)
}
 0x29e   : > { %s1194_s23 = scalar_lea.hbm %s1525_s5, 128  ;;  %s1198_s29 = scalar_lea.hbm %s1579_s4, 256 }
 0x29f   : > { %p1195_p9 = scmp.ne.s32.totalorder %s1525_s5, %s1194_s23  ;;  %p1199_p7 = scmp.lt.u32.totalorder %s1525_s5, %s1579_s4 }
 0x2a0   : > { %p1200_p3 = scmp.lt.u32.totalorder %s1198_s29, %s1194_s23  ;;  %p1202_p4 = scmp.lt.u32.totalorder %s1194_s23, %s1525_s5 }
 0x2a1   : > { %p1196_p1 = pnand %p1195_p9, %p1397_p10 }
 0x2a2   : > { %p1201_p13 = por %p1200_p3, %p1199_p7 }
 0x2a3   : > { %p1197_p2 = pneg %p1196_p1 }
 0x2a4   : > { %p1203_p6 = por %p1202_p4, %p1201_p13 }
 0x2a6   : > { %p1204_p8 = pnand %p1203_p6, %p1197_p2 }
 0x2a8   : > { %1207 = shalt.err (!%p1204_p8)
}
 0x2a9   : > { %1046 = dma.vmem_to_hbm [thread:$0]  (%p1397_p10), %s1527_s13, 128, %s1525_s5, %s774_s9  }
 0x2aa PF: > { %s800_s24 = sand.u32 1, %s1246_s15   ;;  %p1597_p12 = scmp.ne.s32.totalorder %s1587_s25, 0 }
 0x2ab   : > { %p1598_p11 = scmp.ge.s32.totalorder %s1266_s19, 2  ;;  %s801_s26 = scalar_lea.sflag [#allocation7], %s800_s24 }
 0x2ad   : > { %p1057_p0 = pnand %p1598_p11, %p1597_p12 }
 0x2af   : > { %1241 = dma.done.wait (!%p1057_p0), %s801_s26, 128  }
 0x2b0   : > { %1243 = vsyncadd (!%p1057_p0), %s801_s26, 4294967168  ;;  %s22_s19 = sadd.s32 1, %s1266_s19   ;;  %s1599_s15 = smov %s1250_s0 }
 0x2b1   : > { %p19_p5 = scmp.ge.s32.totalorder %s22_s19, 4   ;;  %s1600_s0 = smov %s1254_s16 }
 0x2b2   : > { %s1601_s16 = smov %s1406_s8  ;;  %s1602_s17 = smov %s1262_s18 }
 0x2b3   : > { %s1603_s18 = smov %s1605_s30  ;;  %21 = sbr.rel (!%p19_p5) target bundleno = 7 (0x7), region = 89 }
 0x2ba   :  { %806 = vsyncpa [#allocation6], 1 }
 0x2bb   :  { %808 = vsyncpa [#allocation6 + $0x1], 1 }
 0x2bc   :  { %809 = vsyncpa [#allocation9], 1 }
 0x2bd   :  { %810 = vsyncpa [#allocation7], 1 }
 0x2be   :  { %812 = vsyncpa [#allocation7 + $0x1], 1 }

</bundles_post_ra>
